<compile_context>
chip_gen: v5e
topology: v5e:2x2
jax: 0.10.0
libtpu: 0.0.40
codegen_flags: <defaults>
</compile_context>

<pallas_src>
import jax
import jax.numpy as jnp
from jax.experimental import pallas as pl
from jax.experimental.pallas import tpu as pltpu

MU_BN_EPS = 1e-4            # nn.BatchNorm1d(n_latent, momentum=0.8, eps=0.0001)
LV_BN_EPS = 1e-3            # nn.BatchNorm1d(n_latent, momentum=0.8, eps=0.001)
DROPOUT_P = 0.2
_MATMUL_DTYPE = jnp.bfloat16    # MXU-native streamed operands; accumulation stays f32


def _round_up(x, m):
    return (x + m - 1) // m * m


def _softplus(x):
    # matches torch.nn.Softplus(beta=1, threshold=20)
    return jnp.where(x > 20.0, x, jnp.log1p(jnp.exp(jnp.minimum(x, 20.0))))


def gaussian_dist_kernel(x_ref, w_ref, p_ref, noise_ref,   # inputs
                         z_ref, kl_ref,                     # outputs
                         acc_ref):                          # VMEM scratch (B, 2*Lp) f32
    k = pl.program_id(0)

    @pl.when(k == 0)
    def _init():
        acc_ref[...] = jnp.zeros_like(acc_ref)

    # Fused mu|lv matmul tile: (B, tE) bf16 @ (tE, 2*Lp) bf16, accumulated in f32.
    acc_ref[...] += jnp.dot(x_ref[...], w_ref[...], preferred_element_type=jnp.float32)

    @pl.when(k == pl.num_programs(0) - 1)
    def _epilogue():
        batch = acc_ref.shape[0]
        lp = z_ref.shape[1]

        p = p_ref[...]
        bias, gamma, beta = p[0:1, :], p[1:2, :], p[2:3, :]
        bn_eps, kl_mask = p[3:4, :], p[4:5, :]

        y = acc_ref[...] + bias                                    # (B, 2*Lp)

        # Fused BatchNorm batch statistics (training mode, biased variance),
        # centered two-pass form for numerical safety.
        inv_b = 1.0 / batch
        mean = jnp.sum(y, axis=0, keepdims=True) * inv_b
        d = y - mean
        var = jnp.sum(d * d, axis=0, keepdims=True) * inv_b
        y_bn = d * jax.lax.rsqrt(var + bn_eps) * gamma + beta

        mu_bn = _softplus(y_bn[:, :lp])                            # mu branch
        lv_bn = y_bn[:, lp:]                                       # log-variance branch

        # Reparameterized sample; reuse s = exp(lv/2) so exp(lv) = s * s.
        noise = noise_ref[...]
        eps = noise[:, :lp]
        keep_scale = noise[:, lp:]                                 # {0, 1/(1-p)} dropout scale
        s = jnp.exp(0.5 * lv_bn)
        z = (mu_bn + s * eps) * keep_scale                         # sample + post-sample dropout

        # KL = -0.5 * sum(1 + lv - mu^2 - exp(lv)) over the real latent columns only.
        kl_terms = (1.0 + lv_bn - mu_bn * mu_bn - s * s) * kl_mask[:, :lp]
        kl = -0.5 * jnp.sum(kl_terms, axis=1, keepdims=True)       # (B, 1)

        z_ref[...] = z.astype(z_ref.dtype)
        # Lane-dense KL store: broadcast across 128 lanes; wrapper reads column 0.
        kl_ref[...] = jnp.broadcast_to(kl, kl_ref.shape).astype(kl_ref.dtype)


def _vmem_budget():
    """(tiling budget, vmem_limit_bytes) derived from the chip's physical VMEM."""
    try:
        cap = int(pltpu.get_tpu_info().vmem_capacity_bytes)
    except Exception:
        cap = 64 * 1024 * 1024            # conservative (v7x-sized) fallback / interpret mode
    return int(cap * 0.70), int(cap * 0.90)


def _choose_e_tile(batch, n_cat, lp, enc, budget_bytes):
    """Largest encoder-axis tile whose per-step VMEM footprint fits the budget."""
    # Resident (single-buffered, constant index map) allocations:
    fixed = (batch * n_cat * 4          # f32 accumulator scratch
             + batch * lp * 4           # z output block
             + batch * 128 * 4          # lane-dense KL output block
             + 8 * n_cat * 4            # packed param slab (f32)
             + batch * n_cat * 4)       # eps | dropout-scale slab (f32)
    # Streamed, double-buffered bf16 tiles per E column: data (B, te) + weight (te, n_cat).
    per_col = 2 * 2 * (batch + n_cat)
    avail = max(budget_bytes - fixed, 128 * per_col)
    te = min(avail // per_col, 16384)   # multi-MiB weight tiles amortize grid-step overhead
    if te >= enc:
        return int(enc)                 # single K step; no encoder-axis padding needed
    return int(max(512, (te // 512) * 512))


def prepare_gaussian_params(params, batch_size_hint=128):
    """Build the fused bf16 weight slab and packed f32 param slab ONCE; reuse per forward."""
    enc, n_lat = params["w_mu"].shape
    lp = _round_up(n_lat, 128)          # lane-aligned latent width; 2*lp % 256 == 0
    n_cat = 2 * lp

    budget, vmem_limit = _vmem_budget()
    te = _choose_e_tile(batch_size_hint, n_cat, lp, enc, budget)
    e_pad = _round_up(enc, te)

    f32 = jnp.float32
    pad_cols = lambda v: jnp.pad(v.astype(f32), ((0, 0), (0, lp - n_lat)))

    # Fused, padded weight: mu branch in columns [0, lp), lv branch in [lp, 2*lp).
    w_cat = jnp.concatenate(
        [jnp.pad(params["w_mu"].astype(f32), ((0, e_pad - enc), (0, lp - n_lat))),
         jnp.pad(params["w_lv"].astype(f32), ((0, e_pad - enc), (0, lp - n_lat)))],
        axis=1).astype(_MATMUL_DTYPE)

    # Packed parameter slab (8, 2*lp): bias / gamma / beta / per-column BN eps / KL mask.
    col_mask = (jnp.arange(lp) < n_lat).astype(f32)[None, :]
    rows = [
        jnp.concatenate([pad_cols(params["b_mu"]), pad_cols(params["b_lv"])], axis=1),
        jnp.concatenate([pad_cols(params["g_mu"]), pad_cols(params["g_lv"])], axis=1),
        jnp.concatenate([pad_cols(params["beta_mu"]), pad_cols(params["beta_lv"])], axis=1),
        jnp.concatenate([jnp.full((1, lp), MU_BN_EPS, f32),
                         jnp.full((1, lp), LV_BN_EPS, f32)], axis=1),
        jnp.concatenate([col_mask, col_mask], axis=1),
    ]
    param_slab = jnp.concatenate(rows + [jnp.zeros((3, n_cat), f32)], axis=0)

    return {"w_cat": w_cat, "param_slab": param_slab,
            "n_latent": n_lat, "lp": lp, "n_cat": n_cat,
            "enc": enc, "e_pad": e_pad, "te": te,
            "vmem_limit": vmem_limit}


def gaussian_distribution_forward(data, prepared, key):
    """data: (B, enc_size) f32.  Returns (z: (B, n_latent) f32, KL: (B,) f32)."""
    batch, enc = data.shape
    assert enc == prepared["enc"]
    lp, n_cat = prepared["lp"], prepared["n_cat"]
    te, e_pad = prepared["te"], prepared["e_pad"]
    n_lat = prepared["n_latent"]
    f32 = jnp.float32

    # Reparameterization noise and inverted-dropout scale, packed lane-dense (B, 2*Lp).
    k_eps, k_drop = jax.random.split(key)
    eps = jax.random.normal(k_eps, (batch, lp), f32)
    keep = jax.random.bernoulli(k_drop, 1.0 - DROPOUT_P, (batch, lp))
    keep_scale = keep.astype(f32) * (1.0 / (1.0 - DROPOUT_P))
    noise = jnp.concatenate([eps, keep_scale], axis=1)

    data_bf = data.astype(_MATMUL_DTYPE)
    if e_pad != enc:
        data_bf = jnp.pad(data_bf, ((0, 0), (0, e_pad - enc)))

    z_pad, kl_pad = pl.pallas_call(
        gaussian_dist_kernel,
        out_shape=(jax.ShapeDtypeStruct((batch, lp), f32),
                   jax.ShapeDtypeStruct((batch, 128), f32)),
        grid_spec=pltpu.PrefetchScalarGridSpec(
            num_scalar_prefetch=0,
            grid=(e_pad // te,),
            in_specs=[
                pl.BlockSpec((batch, te), lambda k: (0, k)),     # data: stream E tiles (bf16)
                pl.BlockSpec((te, n_cat), lambda k: (k, 0)),     # fused mu|lv weight (bf16)
                pl.BlockSpec((8, n_cat), lambda k: (0, 0)),      # packed param slab (resident)
                pl.BlockSpec((batch, n_cat), lambda k: (0, 0)),  # eps | dropout scale (resident)
            ],
            out_specs=(
                pl.BlockSpec((batch, lp), lambda k: (0, 0)),     # z (resident block)
                pl.BlockSpec((batch, 128), lambda k: (0, 0)),    # KL (lane-dense)
            ),
            scratch_shapes=[pltpu.VMEM((batch, n_cat), jnp.float32)],
        ),
        compiler_params=pltpu.CompilerParams(
            dimension_semantics=("arbitrary",),                  # K reduction over enc tiles
            vmem_limit_bytes=prepared["vmem_limit"],
        ),
    )(data_bf, prepared["w_cat"], prepared["param_slab"], noise)

    return z_pad[:, :n_lat], kl_pad[:, 0]


def init_params(key, enc_size, n_latent):
    """Deterministic parameter init mirroring nn.Linear / nn.BatchNorm1d shapes."""
    k1, k2, k3, k4 = jax.random.split(key, 4)
    bound = 1.0 / (enc_size ** 0.5)
    return {
        # Linear weights stored transposed: (enc_size, n_latent)
        "w_mu": jax.random.uniform(k1, (enc_size, n_latent), jnp.float32, -bound, bound),
        "b_mu": jax.random.uniform(k2, (1, n_latent), jnp.float32, -bound, bound),
        "w_lv": jax.random.uniform(k3, (enc_size, n_latent), jnp.float32, -bound, bound),
        "b_lv": jax.random.uniform(k4, (1, n_latent), jnp.float32, -bound, bound),
        # BatchNorm affine params (PyTorch default init: gamma=1, beta=0)
        "g_mu": jnp.ones((1, n_latent), jnp.float32),
        "beta_mu": jnp.zeros((1, n_latent), jnp.float32),
        "g_lv": jnp.ones((1, n_latent), jnp.float32),
        "beta_lv": jnp.zeros((1, n_latent), jnp.float32),
    }


if __name__ == "__main__":
    batch, enc_size, n_latent = 8, 32, 16

    key = jax.random.PRNGKey(0)
    k_data, k_param, k_fwd = jax.random.split(key, 3)

    data = jax.random.normal(k_data, (batch, enc_size), jnp.float32)
    params = init_params(k_param, enc_size, n_latent)
    prepared = prepare_gaussian_params(params, batch_size_hint=batch)

    z, kl = gaussian_distribution_forward(data, prepared, k_fwd)
    jax.block_until_ready((z, kl))

    assert z.shape == (batch, n_latent) and kl.shape == (batch,)
    assert bool(jnp.isfinite(z).all()) and bool(jnp.isfinite(kl).all())
    print("KERNEL_OK")
</pallas_src>

<mosaic_0001>
module attributes {stable_mosaic.version = 11 : i64} {
  func.func @gaussian_dist_kernel(%arg0: i32, %arg1: memref<8x32xbf16, #tpu.memory_space<vmem>>, %arg2: memref<32x256xbf16, #tpu.memory_space<vmem>>, %arg3: memref<8x256xf32, #tpu.memory_space<vmem>>, %arg4: memref<8x256xf32, #tpu.memory_space<vmem>>, %arg5: memref<8x128xf32, #tpu.memory_space<vmem>>, %arg6: memref<8x128xf32, #tpu.memory_space<vmem>>, %arg7: memref<8x256xf32, #tpu.memory_space<vmem>>) attributes {dimension_semantics = [#tpu.dimension_semantics<arbitrary>], iteration_bounds = array<i64: 1>, scalar_prefetch = 0 : i64, scratch_operands = 1 : i64, tpu.core_type = #tpu.core_type<tc>, window_params = [{transform_indices = @transform_0, window_bounds = array<i64: 8, 32>}, {transform_indices = @transform_1, window_bounds = array<i64: 32, 256>}, {pipeline_mode = #tpu.pipeline_mode<synchronous>, transform_indices = @transform_2, window_bounds = array<i64: 8, 256>}, {pipeline_mode = #tpu.pipeline_mode<synchronous>, transform_indices = @transform_3, window_bounds = array<i64: 8, 256>}, {pipeline_mode = #tpu.pipeline_mode<synchronous>, transform_indices = @transform_4, window_bounds = array<i64: 8, 128>}, {pipeline_mode = #tpu.pipeline_mode<synchronous>, transform_indices = @transform_5, window_bounds = array<i64: 8, 128>}]} {
    %c0_i32 = arith.constant 0 : i32
    %0 = arith.cmpi eq, %arg0, %c0_i32 : i32
    %1 = arith.extui %0 : i1 to i32
    %c0_i32_0 = arith.constant 0 : i32
    %2 = arith.cmpi ne, %1, %c0_i32_0 : i32
    scf.if %2 {
      %cst_10 = arith.constant 0.000000e+00 : f32
      %12 = vector.broadcast %cst_10 : f32 to vector<8x256xf32>
      %c0_11 = arith.constant 0 : index
      %c0_12 = arith.constant 0 : index
      %13 = vector.load %arg7[%c0_11, %c0_12] : memref<8x256xf32, #tpu.memory_space<vmem>>, vector<8x256xf32>
      tpu.vector_store %arg7[%c0_11, %c0_12], %12 {strides = array<i32>} : memref<8x256xf32, #tpu.memory_space<vmem>>, vector<8x256xf32>,
    } else {
    }
    %c0 = arith.constant 0 : index
    %c0_1 = arith.constant 0 : index
    %3 = vector.load %arg7[%c0, %c0_1] : memref<8x256xf32, #tpu.memory_space<vmem>>, vector<8x256xf32>
    %c0_2 = arith.constant 0 : index
    %c0_3 = arith.constant 0 : index
    %4 = vector.load %arg1[%c0_2, %c0_3] : memref<8x32xbf16, #tpu.memory_space<vmem>>, vector<8x32xbf16>
    %c0_4 = arith.constant 0 : index
    %c0_5 = arith.constant 0 : index
    %5 = vector.load %arg2[%c0_4, %c0_5] : memref<32x256xbf16, #tpu.memory_space<vmem>>, vector<32x256xbf16>
    %cst = arith.constant dense<0.000000e+00> : vector<8x256xf32>
    %6 = tpu.matmul %4, %5, %cst {dimension_numbers = #tpu.dot_dimension_numbers<[1], [0], [0], [1], [0, 0, 1, 1], [], []>} : vector<8x32xbf16>, vector<32x256xbf16>, vector<8x256xf32> -> vector<8x256xf32>
    %7 = arith.addf %3, %6 : vector<8x256xf32>
    %c0_6 = arith.constant 0 : index
    %c0_7 = arith.constant 0 : index
    %8 = vector.load %arg7[%c0_6, %c0_7] : memref<8x256xf32, #tpu.memory_space<vmem>>, vector<8x256xf32>
    tpu.vector_store %arg7[%c0_6, %c0_7], %7 {strides = array<i32>} : memref<8x256xf32, #tpu.memory_space<vmem>>, vector<8x256xf32>,
    %c0_i32_8 = arith.constant 0 : i32
    %9 = arith.cmpi eq, %arg0, %c0_i32_8 : i32
    %10 = arith.extui %9 : i1 to i32
    %c0_i32_9 = arith.constant 0 : i32
    %11 = arith.cmpi ne, %10, %c0_i32_9 : i32
    scf.if %11 {
      %c0_10 = arith.constant 0 : index
      %c0_11 = arith.constant 0 : index
      %12 = vector.load %arg3[%c0_10, %c0_11] : memref<8x256xf32, #tpu.memory_space<vmem>>, vector<8x256xf32>
      %13 = vector.extract_strided_slice %12 {offsets = [0, 0], sizes = [1, 256], strides = [1, 1]} : vector<8x256xf32> to vector<1x256xf32>
      %14 = vector.extract_strided_slice %12 {offsets = [1, 0], sizes = [1, 256], strides = [1, 1]} : vector<8x256xf32> to vector<1x256xf32>
      %15 = vector.extract_strided_slice %12 {offsets = [2, 0], sizes = [1, 256], strides = [1, 1]} : vector<8x256xf32> to vector<1x256xf32>
      %16 = vector.extract_strided_slice %12 {offsets = [3, 0], sizes = [1, 256], strides = [1, 1]} : vector<8x256xf32> to vector<1x256xf32>
      %17 = vector.extract_strided_slice %12 {offsets = [4, 0], sizes = [1, 256], strides = [1, 1]} : vector<8x256xf32> to vector<1x256xf32>
      %c0_12 = arith.constant 0 : index
      %c0_13 = arith.constant 0 : index
      %18 = vector.load %arg7[%c0_12, %c0_13] : memref<8x256xf32, #tpu.memory_space<vmem>>, vector<8x256xf32>
      %19 = vector.broadcast %13 : vector<1x256xf32> to vector<8x256xf32>
      %20 = arith.addf %18, %19 : vector<8x256xf32>
      %cst_14 = arith.constant dense<0.000000e+00> : vector<256xf32>
      %21 = vector.multi_reduction <add>, %20, %cst_14 [0] : vector<8x256xf32> to vector<256xf32>
      %22 = vector.shape_cast %21 : vector<256xf32> to vector<1x256xf32>
      %cst_15 = arith.constant 1.250000e-01 : f32
      %23 = vector.broadcast %cst_15 : f32 to vector<1x256xf32>
      %24 = arith.mulf %22, %23 : vector<1x256xf32>
      %25 = vector.broadcast %24 : vector<1x256xf32> to vector<8x256xf32>
      %26 = arith.subf %20, %25 : vector<8x256xf32>
      %27 = arith.mulf %26, %26 : vector<8x256xf32>
      %cst_16 = arith.constant dense<0.000000e+00> : vector<256xf32>
      %28 = vector.multi_reduction <add>, %27, %cst_16 [0] : vector<8x256xf32> to vector<256xf32>
      %29 = vector.shape_cast %28 : vector<256xf32> to vector<1x256xf32>
      %cst_17 = arith.constant 1.250000e-01 : f32
      %30 = vector.broadcast %cst_17 : f32 to vector<1x256xf32>
      %31 = arith.mulf %29, %30 : vector<1x256xf32>
      %32 = arith.addf %31, %16 : vector<1x256xf32>
      %33 = math.rsqrt %32 : vector<1x256xf32>
      %34 = vector.broadcast %33 : vector<1x256xf32> to vector<8x256xf32>
      %35 = arith.mulf %26, %34 : vector<8x256xf32>
      %36 = vector.broadcast %14 : vector<1x256xf32> to vector<8x256xf32>
      %37 = arith.mulf %35, %36 : vector<8x256xf32>
      %38 = vector.broadcast %15 : vector<1x256xf32> to vector<8x256xf32>
      %39 = arith.addf %37, %38 : vector<8x256xf32>
      %40 = vector.extract_strided_slice %39 {offsets = [0, 0], sizes = [8, 128], strides = [1, 1]} : vector<8x256xf32> to vector<8x128xf32>
      %cst_18 = arith.constant 2.000000e+01 : f32
      %41 = vector.broadcast %cst_18 : f32 to vector<8x128xf32>
      %42 = arith.cmpf ogt, %40, %41 : vector<8x128xf32>
      %cst_19 = arith.constant 2.000000e+01 : f32
      %43 = vector.broadcast %cst_19 : f32 to vector<8x128xf32>
      %44 = arith.minimumf %40, %43 : vector<8x128xf32>
      %45 = math.exp %44 : vector<8x128xf32>
      %46 = math.log1p %45 : vector<8x128xf32>
      %47 = arith.select %42, %40, %46 : vector<8x128xi1>, vector<8x128xf32>
      %48 = vector.extract_strided_slice %39 {offsets = [0, 128], sizes = [8, 128], strides = [1, 1]} : vector<8x256xf32> to vector<8x128xf32>
      %c0_20 = arith.constant 0 : index
      %c0_21 = arith.constant 0 : index
      %49 = vector.load %arg4[%c0_20, %c0_21] : memref<8x256xf32, #tpu.memory_space<vmem>>, vector<8x256xf32>
      %50 = vector.extract_strided_slice %49 {offsets = [0, 0], sizes = [8, 128], strides = [1, 1]} : vector<8x256xf32> to vector<8x128xf32>
      %51 = vector.extract_strided_slice %49 {offsets = [0, 128], sizes = [8, 128], strides = [1, 1]} : vector<8x256xf32> to vector<8x128xf32>
      %cst_22 = arith.constant 5.000000e-01 : f32
      %52 = vector.broadcast %cst_22 : f32 to vector<8x128xf32>
      %53 = arith.mulf %52, %48 : vector<8x128xf32>
      %54 = math.exp %53 : vector<8x128xf32>
      %55 = arith.mulf %54, %50 : vector<8x128xf32>
      %56 = arith.addf %47, %55 : vector<8x128xf32>
      %57 = arith.mulf %56, %51 : vector<8x128xf32>
      %cst_23 = arith.constant 1.000000e+00 : f32
      %58 = vector.broadcast %cst_23 : f32 to vector<8x128xf32>
      %59 = arith.addf %58, %48 : vector<8x128xf32>
      %60 = arith.mulf %47, %47 : vector<8x128xf32>
      %61 = arith.subf %59, %60 : vector<8x128xf32>
      %62 = arith.mulf %54, %54 : vector<8x128xf32>
      %63 = arith.subf %61, %62 : vector<8x128xf32>
      %64 = vector.extract_strided_slice %17 {offsets = [0, 0], sizes = [1, 128], strides = [1, 1]} : vector<1x256xf32> to vector<1x128xf32>
      %65 = vector.broadcast %64 : vector<1x128xf32> to vector<8x128xf32>
      %66 = arith.mulf %63, %65 : vector<8x128xf32>
      %cst_24 = arith.constant dense<0.000000e+00> : vector<8xf32>
      %67 = vector.multi_reduction <add>, %66, %cst_24 [1] : vector<8x128xf32> to vector<8xf32>
      %68 = vector.shape_cast %67 : vector<8xf32> to vector<8x1xf32>
      %cst_25 = arith.constant -5.000000e-01 : f32
      %69 = vector.broadcast %cst_25 : f32 to vector<8x1xf32>
      %70 = arith.mulf %69, %68 : vector<8x1xf32>
      %c0_26 = arith.constant 0 : index
      %c0_27 = arith.constant 0 : index
      %71 = vector.load %arg5[%c0_26, %c0_27] : memref<8x128xf32, #tpu.memory_space<vmem>>, vector<8x128xf32>
      tpu.vector_store %arg5[%c0_26, %c0_27], %57 {strides = array<i32>} : memref<8x128xf32, #tpu.memory_space<vmem>>, vector<8x128xf32>,
      %72 = vector.shape_cast %70 : vector<8x1xf32> to vector<8x1xf32>
      %73 = vector.broadcast %72 : vector<8x1xf32> to vector<8x128xf32>
      %c0_28 = arith.constant 0 : index
      %c0_29 = arith.constant 0 : index
      %74 = vector.load %arg6[%c0_28, %c0_29] : memref<8x128xf32, #tpu.memory_space<vmem>>, vector<8x128xf32>
      tpu.vector_store %arg6[%c0_28, %c0_29], %73 {strides = array<i32>} : memref<8x128xf32, #tpu.memory_space<vmem>>, vector<8x128xf32>,
    } else {
    }
    return
  }
  func.func @transform_0(%arg0: i32) -> (i32, i32) {
    %c0_i32 = arith.constant 0 : i32
    %c0_i32_0 = arith.constant 0 : i32
    return %c0_i32, %arg0 : i32, i32
  }
  func.func @transform_1(%arg0: i32) -> (i32, i32) {
    %c0_i32 = arith.constant 0 : i32
    %c0_i32_0 = arith.constant 0 : i32
    return %arg0, %c0_i32 : i32, i32
  }
  func.func @transform_2(%arg0: i32) -> (i32, i32) {
    %c0_i32 = arith.constant 0 : i32
    %c0_i32_0 = arith.constant 0 : i32
    %c0_i32_1 = arith.constant 0 : i32
    return %c0_i32, %c0_i32_0 : i32, i32
  }
  func.func @transform_3(%arg0: i32) -> (i32, i32) {
    %c0_i32 = arith.constant 0 : i32
    %c0_i32_0 = arith.constant 0 : i32
    %c0_i32_1 = arith.constant 0 : i32
    return %c0_i32, %c0_i32_0 : i32, i32
  }
  func.func @transform_4(%arg0: i32) -> (i32, i32) {
    %c0_i32 = arith.constant 0 : i32
    %c0_i32_0 = arith.constant 0 : i32
    %c0_i32_1 = arith.constant 0 : i32
    return %c0_i32, %c0_i32_0 : i32, i32
  }
  func.func @transform_5(%arg0: i32) -> (i32, i32) {
    %c0_i32 = arith.constant 0 : i32
    %c0_i32_0 = arith.constant 0 : i32
    %c0_i32_1 = arith.constant 0 : i32
    return %c0_i32, %c0_i32_0 : i32, i32
  }
}

</mosaic_0001>

<bundles_post_ra>
// kernel: tpu_custom_call.1
= control target key start
LH: loop header
LB: loop body
LE: loop exit
PB: predicated region body
PF: predicated region fallthrough
CT: control target
= control target key end

     0   :  { %11 = vsyncpa [#allocation4], 0  ;;  %s555_s0 = inlined_call_operand.hbm [shape: bf16[8,32], index: 0, kind: input, shape index: {}]   ;;  %s556_s1 = inlined_call_operand.hbm [shape: bf16[32,256], index: 1, kind: input, shape index: {}]   ;;  %s557_s2 = inlined_call_operand.hbm [shape: f32[8,256], index: 2, kind: input, shape index: {}]   ;;  %s558_s3 = inlined_call_operand.hbm [shape: f32[8,256], index: 3, kind: input, shape index: {}]   ;;  %s559_s4 = inlined_call_operand.hbm [shape: f32[8,128], index: 4, kind: output, shape index: {0}]   ;;  %s560_s5 = inlined_call_operand.hbm [shape: f32[8,128], index: 5, kind: output, shape index: {1}]  }
   0x1   :  { %12 = vsyncpa [#allocation7], 0 }
   0x2   :  { %13 = vsyncpa [#allocation10], 0 }
   0x3   :  { %14 = vsyncpa [#allocation5], 0  ;;  %s31_s20 = sshll.u32 %s556_s1, 4  ;;  %s32_s20 = int_to_ptr.hbm [resolvable:$true] %s31_s20 }
   0x4   :  { %15 = vsyncpa [#allocation13], 0  ;;  %s486_s21 = smov [#allocation6]   ;;  %s21_s25 = sshll.u32 %s555_s0, 4  ;;  %s22_s25 = int_to_ptr.hbm [resolvable:$true] %s21_s25 }
   0x5   :  { %s33_s22 = sshll.u32 %s486_s21, 4  ;;  %s487_s26 = smov 128   ;;  %s34_s22 = int_to_ptr.vmem [resolvable:$true] %s33_s22 }
   0x6   :  { %s488_s27 = smov 8   ;;  %s489_s28 = smov [#allocation3]  }
   0x7   :  { %39 = dma.hbm_to_vmem [thread:$0]  %s32_s20, 512, %s34_s22, [#allocation7], %s487_s26, %s487_s26, %s488_s27  }
   0x8   :  { %s23_s29 = sshll.u32 %s489_s28, 4  ;;  %s45_s7 = sshll.u32 %s557_s2, 4  ;;  %s24_s29 = int_to_ptr.vmem [resolvable:$true] %s23_s29  ;;  %s46_s7 = int_to_ptr.hbm [resolvable:$true] %s45_s7 }
   0x9   :  { %26 = dma.hbm_to_vmem [thread:$0]  %s22_s25, 64, %s24_s29, [#allocation4]  }
   0xa   :  { %s56_s9 = sshll.u32 %s558_s3, 4  ;;  %s490_s10 = smov [#allocation8]   ;;  %s57_s9 = int_to_ptr.hbm [resolvable:$true] %s56_s9 }
   0xb   :  { %s47_s11 = sshll.u32 %s490_s10, 4  ;;  %s491_s0 = smov [#allocation9]   ;;  %s48_s11 = int_to_ptr.vmem [resolvable:$true] %s47_s11 }
   0xc   :  { %50 = dma.hbm_to_vmem [thread:$0]  %s46_s7, 256, %s48_s11, [#allocation7]  }
   0xd   :  { %s58_s12 = sshll.u32 %s491_s0, 4  ;;  %s59_s12 = int_to_ptr.vmem [resolvable:$true] %s58_s12 }
   0xe   :  { %61 = dma.hbm_to_vmem [thread:$0]  %s57_s9, 256, %s59_s12, [#allocation10]  }
   0xf   :  { %476 = dma.done.wait [#allocation4], 64  }
  0x10   :  { %477 = vsyncadd [#allocation4], 4294967232 }
  0x11   :  { %478 = dma.done.wait [#allocation7], 768  }
  0x12   :  { %479 = vsyncadd [#allocation7], 4294966528 }
  0x13   :  { %480 = dma.done.wait [#allocation10], 256  }
  0x14   :  { %481 = vsyncadd [#allocation10], 4294967040  ;;  %v302_v0 = vld [vmem:[#allocation6 + $0x10] sm:$0xf]  ;;  %v313_v1 = vld [vmem:[#allocation6 + $0x14] sm:$0xf0] }
  0x15   :  { %v312_v2 = vld [vmem:[#allocation6 + $0x14] sm:$0xf]  ;;  %v303_v3 = vor.u32 %v313_v1, %v302_v0  ;;  %v304_v4 = vld [vmem:[#allocation6 + $0x18] sm:$0xf0]  ;;  %v294_v5 = vld [vmem:[#allocation6] sm:$0xf] }
  0x16   :  { %v311_v6 = vld [vmem:[#allocation6 + $0x4] sm:$0xf0]  ;;  %v307_v7 = vor.u32 %v312_v2, %v304_v4  ;;  %v310_v8 = vld [vmem:[#allocation6 + $0x4] sm:$0xf]  ;;  %v296_v9 = vld [vmem:[#allocation6 + $0x8] sm:$0xf0] }
  0x17   :  { %122 = vmatpush.bf16.msra.mxu0 %v303_v3  ;;  %v295_v10 = vor.u32 %v311_v6, %v294_v5  ;;  %v299_v11 = vor.u32 %v310_v8, %v296_v9  ;;  %v87_v12 = vld [vmem:[#allocation3] sm:$0xf]  ;;  %vm112_vm0 = vcmask 261120   ;;  %v536_v13 = vld [vmem:[#allocation8] sm:$0xff]  ;;  %v538_v14 = vld [vmem:[#allocation8 + $0x8] sm:$0xff]  ;;  %s492_s2 = smov [#allocation11]  }
  0x18   :  { %135 = vmatpush.bf16.msra.mxu1 %v307_v7  ;;  %v153_v15 = vperm.slane %v536_v13, 0  ;;  %v154_v16 = vperm.slane %v538_v14, 0  ;;  %v215_v7 = vperm.slane %v536_v13, 1  ;;  %s262_s3 = sshll.u32 %s492_s2, 4  ;;  %s264_s15 = sshll.u32 %s559_s4, 4  ;;  %s263_s3 = int_to_ptr.vmem [resolvable:$true] %s262_s3  ;;  %s265_s15 = int_to_ptr.hbm [resolvable:$true] %s264_s15 }
  0x19   :  { %s493_s16 = smov [#allocation12]   ;;  %s275_s4 = sshll.u32 %s560_s5, 4  ;;  %s276_s4 = int_to_ptr.hbm [resolvable:$true] %s275_s4 }
  0x1a   :  { %s273_s17 = sshll.u32 %s493_s16, 4  ;;  %s274_s17 = int_to_ptr.vmem [resolvable:$true] %s273_s17 }
  0x1b   :  { %123 = vmatpush.bf16.msra.mxu0 %v295_v10  ;;  %v216_v10 = vperm.slane %v538_v14, 1 }
  0x1c   :  { %136 = vmatpush.bf16.msra.mxu1 %v299_v11 }
  0x1e   :  { %308 = vmatmul.msk.bf16.vlgmr.msra.gmra.mxu0 %vm112_vm0, %v87_v12 }
  0x1f   :  { %309 = vmatmul.msk.bf16.vlgmr.msra.gmra.mxu1 %vm112_vm0, %v87_v12  ;;  %v219_v12 = vperm.slane %v536_v13, 2 }
  0x9b   :  { %v125_v17 = vpop.f32.mrf.mxu0 }
  0x9c   :  { %v155_v18 = vadd.f32 %v153_v15, %v125_v17  ;;  %v138_v19 = vpop.f32.mrf.mxu1  ;;  %v220_v17 = vperm.slane %v538_v14, 2 }
  0x9d   :  { %v156_v20 = vadd.f32 %v154_v16, %v138_v19 }
  0x9e   :  { %v157_v21 = vrot.slane %v155_v18, 4 }
  0x9f   :  { %v163_v22 = vrot.slane %v156_v20, 4 }
  0xa0   :  { %v158_v23 = vadd.f32 %v157_v21, %v155_v18 }
  0xa1   :  { %v164_v24 = vadd.f32 %v163_v22, %v156_v20 }
  0xa2   :  { %v159_v25 = vrot.slane %v158_v23, 2 }
  0xa3   :  { %v165_v26 = vrot.slane %v164_v24, 2  ;;  %v127_v27 = vpop.f32.mrf.mxu0 }
  0xa4   :  { %v160_v28 = vadd.f32 %v159_v25, %v158_v23  ;;  %v140_v29 = vpop.f32.mrf.mxu1 }
  0xa5   :  { %v166_v30 = vadd.f32 %v165_v26, %v164_v24 }
  0xa6   :  { %v161_v31 = vrot.slane %v160_v28, 1 }
  0xa7   :  { %v167_v32 = vrot.slane %v166_v30, 1 }
  0xa8   :  { %v162_v33 = vadd.f32 %v161_v31, %v160_v28 }
  0xa9   :  { %v168_v34 = vadd.f32 %v167_v32, %v166_v30  ;;  %v237_v32 = vld [vmem:[#allocation9] sm:$0xff] }
  0xaa   :  { %v169_v35 = vmul.f32 0.125, %v162_v33 }
  0xab   :  { %v170_v36 = vmul.f32 0.125, %v168_v34 }
  0xac   :  { %v171_v37 = vsub.f32 %v155_v18, %v169_v35 }
  0xad   :  { %v172_v38 = vsub.f32 %v156_v20, %v170_v36 }
  0xae   :  { %v173_v39 = vmul.f32 %v171_v37, %v171_v37 }
  0xaf   :  { %v174_v40 = vmul.f32 %v172_v38, %v172_v38 }
  0xb0   :  { %v175_v41 = vrot.slane %v173_v39, 4 }
  0xb1   :  { %v181_v42 = vrot.slane %v174_v40, 4 }
  0xb2   :  { %v176_v43 = vadd.f32 %v175_v41, %v173_v39 }
  0xb3   :  { %v182_v44 = vadd.f32 %v181_v42, %v174_v40 }
  0xb4   :  { %v177_v45 = vrot.slane %v176_v43, 2 }
  0xb5   :  { %v183_v46 = vrot.slane %v182_v44, 2 }
  0xb6   :  { %v178_v47 = vadd.f32 %v177_v45, %v176_v43  ;;  %v250_v43 = vperm.slane %v536_v13, 4 }
  0xb7   :  { %v184_v48 = vadd.f32 %v183_v46, %v182_v44 }
  0xb8   :  { %v179_v49 = vrot.slane %v178_v47, 1 }
  0xb9   :  { %v185_v50 = vrot.slane %v184_v48, 1 }
  0xba   :  { %v180_v51 = vadd.f32 %v179_v49, %v178_v47 }
  0xbb   :  { %v186_v52 = vadd.f32 %v185_v50, %v184_v48 }
  0xbc   :  { %v187_v53 = vmul.f32 0.125, %v180_v51 }
  0xbd   :  { %v188_v54 = vmul.f32 0.125, %v186_v52 }
  0xbe   :  { %v189_v55 = vadd.f32 %v187_v53, %v536_v13 }
  0xbf   :  { %v190_v56 = vadd.f32 %v188_v54, %v538_v14 }
  0xc0   :  { %322 = vrsqrt.f32 %v189_v55  ;;  %vm197_vm3 = vweird.f32 %v189_v55 }
  0xc1   :  { %324 = vrsqrt.f32 %v190_v56  ;;  %vm207_vm5 = vweird.f32 %v190_v56 }
  0xc6   :  { %v323_v57 = vpop.eup %322 }
  0xc7   :  { %v325_v58 = vpop.eup %324  ;;  %v192_v59 = vmul.f32 %v323_v57, %v189_v55  ;;  %vm198_vm1 = vweird.f32 %v323_v57 }
  0xc8   :  { %v202_v60 = vmul.f32 %v325_v58, %v190_v56  ;;  %vm208_vm2 = vweird.f32 %v325_v58  ;;  %vm199_vm4 = vmor %vm197_vm3, %vm198_vm1 }
  0xc9   :  { %v193_v61 = vmul.f32 %v323_v57, %v192_v59  ;;  %vm209_vm6 = vmor %vm207_vm5, %vm208_vm2 }
  0xca   :  { %v203_v62 = vmul.f32 %v325_v58, %v202_v60 }
  0xcb   :  { %v194_v63 = vmul.f32 0.5, %v193_v61 }
  0xcc   :  { %v204_v0 = vmul.f32 0.5, %v203_v62 }
  0xcd   :  { %v195_v1 = vsub.f32 1.5, %v194_v63 }
  0xce   :  { %v205_v2 = vsub.f32 1.5, %v204_v0 }
  0xcf   :  { %v196_v3 = vmul.f32 %v323_v57, %v195_v1 }
  0xd0   :  { %v206_v4 = vmul.f32 %v325_v58, %v205_v2 }
  0xd1   :  { %v200_v5 = vsel %vm199_vm4, %v323_v57, %v196_v3 }
  0xd2   :  { %v211_v6 = vperm.slane %v200_v5, 3  ;;  %v210_v8 = vsel %vm209_vm6, %v325_v58, %v206_v4 }
  0xd3   :  { %v212_v9 = vperm.slane %v210_v8, 3 }
  0xd4   :  { %v213_v11 = vmul.f32 %v211_v6, %v171_v37  ;;  %v238_v37 = vld [vmem:[#allocation9 + $0x8] sm:$0xff] }
  0xd5   :  { %v214_v15 = vmul.f32 %v212_v9, %v172_v38 }
  0xd6   :  { %v217_v16 = vmul.f32 %v215_v7, %v213_v11 }
  0xd7   :  { %v218_v18 = vmul.f32 %v216_v10, %v214_v15 }
  0xd8   :  { %v221_v19 = vadd.f32 %v219_v12, %v217_v16 }
  0xd9   :  { %v222_v21 = vadd.f32 %v220_v17, %v218_v18 }
  0xda   :  { %v224_v20 = vmin.f32 %v221_v19, 20.0  ;;  %vm223_vm8 = vcmp.gt.f32.partialorder %v221_v19, 20.0 }
  0xdb   :  { %v239_v23 = vmul.f32 0.5, %v222_v21  ;;  %v245_v38 = vadd.f32 1.0, %v222_v21 }
  0xdc   :  { %v225_v22 = vmul.f32 1.442695, %v224_v20 }
  0xdd   :  { %v240_v24 = vmul.f32 1.442695, %v239_v23 }
  0xde   :  { %326 = vpow2.f32 %v225_v22 }
  0xdf   :  { %328 = vpow2.f32 %v240_v24 }
  0xe4   :  { %v327_v25 = vpop.eup %326 }
  0xe5   :  { %v227_v26 = vadd.f32 1.0, %v327_v25  ;;  %v230_v27 = vmul.f32 -0.5, %v327_v25  ;;  %v233_v29 = vand.u32 2147483647, %v327_v25  ;;  %v329_v30 = vpop.eup %328 }
  0xe6   :  { %v242_v35 = vmul.f32 %v329_v30, %v237_v32  ;;  %v248_v42 = vmul.f32 %v329_v30, %v329_v30 }
  0xe7   :  { %330 = vlog2.f32 %v227_v26  ;;  %v231_v28 = vadd.f32 1.0, %v230_v27  ;;  %vm234_vm7 = vcmp.lt.f32.partialorder %v233_v29, 0.0004427343 }
  0xe9   :  { %v232_v14 = vmul.f32 %v327_v25, %v231_v28 }
  0xed   :  { %v331_v31 = vpop.eup %330 }
  0xee   :  { %v229_v33 = vmul.f32 0.6931472, %v331_v31 }
  0xf0   :  { %v235_v34 = vsel %vm234_vm7, %v232_v14, %v229_v33 }
  0xf1   :  { %v236_v36 = vsel %vm223_vm8, %v221_v19, %v235_v34 }
  0xf2   :  { %v246_v39 = vmul.f32 %v236_v36, %v236_v36  ;;  %v243_v40 = vadd.f32 %v242_v35, %v236_v36 }
  0xf4   :  { %v247_v41 = vsub.f32 %v245_v38, %v246_v39  ;;  %v244_v44 = vmul.f32 %v243_v40, %v238_v37 }
  0xf6   :  { %v249_v45 = vsub.f32 %v247_v41, %v248_v42  ;;  %255 = vst [vmem:[#allocation11] sm:$0xff] %v244_v44 }
  0xf7   :  { %267 = dma.vmem_to_hbm [thread:$0]  %s263_s3, 128, %s265_s15, [#allocation5]  }
  0xf8   :  { %v251_v46 = vmul.f32 %v250_v43, %v249_v45 }
  0xfa   :  { %252 = vadd.xlane.f32.xlu0 %v251_v46 }
 0x16d   :  { %v253_v47 = vpop.xlane.xlu0 %252 }
 0x16e   :  { %v254_v48 = vmul.f32 -0.5, %v253_v47 }
 0x170   :  { %256 = vst [vmem:[#allocation12] sm:$0xff] %v254_v48 }
 0x171   :  { %278 = dma.vmem_to_hbm [thread:$0]  %s274_s17, 128, %s276_s4, [#allocation13]  }
 0x172   :  { %482 = dma.done.wait [#allocation5], 128  }
 0x173   :  { %483 = vsyncadd [#allocation5], 4294967168 }
 0x174   :  { %484 = dma.done.wait [#allocation13], 128  }
 0x175   :  { %485 = vsyncadd [#allocation13], 4294967168 }
 0x176   :  { %287 = vsyncpa [#allocation4], 1 }
 0x177   :  { %288 = vsyncpa [#allocation7], 1 }
 0x178   :  { %289 = vsyncpa [#allocation10], 1 }
 0x179   :  { %290 = vsyncpa [#allocation5], 1 }
 0x17a   :  { %291 = vsyncpa [#allocation13], 1 }

</bundles_post_ra>
